<compile_context>
chip_gen: v6e
topology: v6e:2x2x1
jax: 0.10.0
libtpu: 0.0.40
codegen_flags: <defaults>
</compile_context>

<pallas_src>
from functools import partial

import jax
import jax.numpy as jnp
from jax.experimental import pallas as pl
from jax.experimental.pallas import tpu as pltpu

EPS = 1e-5             # nn.GroupNorm default eps
LANE = 128             # TPU lane width
DEFAULT_L_TILE = 1024  # lanes per grid step; sized to fit default scoped VMEM


def _round_up(a: int, m: int) -> int:
    return (a + m - 1) // m * m


# ---------------------------------------------------------------------------
# Pass 1: per-sample sum / sum-of-squares (single traversal of x).
# grid = (N, L_tiles); L is an "arbitrary" reduction axis and the (1,1,1)
# output blocks act as resident accumulators (init at l == 0).
# ---------------------------------------------------------------------------
def _stats_kernel(x_ref, s_ref, ss_ref):
    l = pl.program_id(1)

    @pl.when(l == 0)
    def _():
        s_ref[...] = jnp.zeros_like(s_ref)
        ss_ref[...] = jnp.zeros_like(ss_ref)

    x = x_ref[0].astype(jnp.float32)          # (C_pad, TL); f32 accumulation
    s_ref[0] = s_ref[0] + jnp.sum(x)
    ss_ref[0] = ss_ref[0] + jnp.sum(x * x)


# ---------------------------------------------------------------------------
# Pass 2: folded normalize + pointwise conv, per (sample, L-tile):
#     y = inv_n * (W_g @ x_tile) + shift_n
# Scaling the (C,C) weight by the per-sample scalar is cheaper than scaling
# the (C, TL) activations or the (C, TL) matmul result.
# ---------------------------------------------------------------------------
def _apply_kernel(x_ref, w_ref, inv_ref, shift_ref, o_ref):
    inv = inv_ref[0]                                             # (1, 1) f32
    w = (w_ref[...].astype(jnp.float32) * inv).astype(x_ref.dtype)
    y = jnp.dot(w, x_ref[0], preferred_element_type=jnp.float32)  # (C_pad, TL)
    o_ref[0] = (y + shift_ref[0]).astype(o_ref.dtype)


@partial(jax.jit, static_argnames=("l_tile",))
def prenorm(x, gamma, beta, w, wb, *, l_tile=DEFAULT_L_TILE):
    """GroupNorm(1, C) followed by pointwise Conv1d(C, C, 1).  x: (N, C, L)."""
    N, C, L = x.shape

    # ---- fold the GroupNorm affine + conv bias into the conv (wrapper-side) ----
    g = gamma.reshape(-1).astype(jnp.float32)          # (C,)
    b = beta.reshape(-1).astype(jnp.float32)           # (C,)
    wbv = wb.reshape(-1).astype(jnp.float32)           # (C,)
    w32 = w.astype(jnp.float32)                        # (C, C)
    w_g = w32 * g[None, :]                             # W_g[o,c] = w[o,c]*gamma[c]
    b_eff = wbv + w32 @ b                              # (C,)
    rowsum = jnp.sum(w_g, axis=1)                      # (C,)  == W_g @ ones

    # ---- pad C to a lane multiple (MXU) and tile/pad L (VMEM + pipelining) ----
    C_pad = _round_up(C, LANE)
    if L > l_tile:
        TL = l_tile
        L_pad = _round_up(L, TL)
    else:
        L_pad = _round_up(L, LANE) if L >= LANE else L
        TL = L_pad
    nL = L_pad // TL

    if C_pad != C or L_pad != L:
        x_p = jnp.pad(x, ((0, 0), (0, C_pad - C), (0, L_pad - L)))
    else:
        x_p = x
    if C_pad != C:
        w_g = jnp.pad(w_g, ((0, C_pad - C), (0, C_pad - C)))
        b_eff = jnp.pad(b_eff, (0, C_pad - C))
        rowsum = jnp.pad(rowsum, (0, C_pad - C))

    # ---- pass 1: stats (zero padding contributes nothing; divide by true C*L) ----
    s, ss = pl.pallas_call(
        _stats_kernel,
        out_shape=(jax.ShapeDtypeStruct((N, 1, 1), jnp.float32),
                   jax.ShapeDtypeStruct((N, 1, 1), jnp.float32)),
        grid_spec=pltpu.PrefetchScalarGridSpec(
            num_scalar_prefetch=0,
            grid=(N, nL),
            in_specs=[pl.BlockSpec((1, C_pad, TL), lambda n, l: (n, 0, l))],
            out_specs=[pl.BlockSpec((1, 1, 1), lambda n, l: (n, 0, 0)),
                       pl.BlockSpec((1, 1, 1), lambda n, l: (n, 0, 0))],
        ),
        compiler_params=pltpu.CompilerParams(
            dimension_semantics=("parallel", "arbitrary")),
    )(x_p)

    cnt = jnp.float32(C * L)                            # TRUE element count
    mean = s[:, 0, 0] / cnt                             # (N,)
    var = jnp.maximum(ss[:, 0, 0] / cnt - mean * mean, 0.0)   # biased var (GN)
    inv = jax.lax.rsqrt(var + EPS)                      # (N,)

    # per-sample per-channel shift: b_eff - inv*mean*rowsum   (tiny XLA math)
    shift = (b_eff[None, :] - (inv * mean)[:, None] * rowsum[None, :])
    shift = shift.reshape(N, C_pad, 1).astype(jnp.float32)
    inv_arr = inv.reshape(N, 1, 1).astype(jnp.float32)
    w_g_cast = w_g.astype(x.dtype)   # bf16 MXU fast path when the model runs bf16

    # ---- pass 2: folded normalize + matmul per L tile ----
    # W_g / inv / shift index_maps are l-invariant so they are fetched once per
    # sample; pl.Buffered(1) could also drop their redundant second buffer, but
    # the default is kept for portability.
    out_p = pl.pallas_call(
        _apply_kernel,
        out_shape=jax.ShapeDtypeStruct((N, C_pad, L_pad), x.dtype),
        grid_spec=pltpu.PrefetchScalarGridSpec(
            num_scalar_prefetch=0,
            grid=(N, nL),
            in_specs=[
                pl.BlockSpec((1, C_pad, TL), lambda n, l: (n, 0, l)),   # x tile
                pl.BlockSpec((C_pad, C_pad), lambda n, l: (0, 0)),      # folded W
                pl.BlockSpec((1, 1, 1), lambda n, l: (n, 0, 0)),        # inv_n
                pl.BlockSpec((1, C_pad, 1), lambda n, l: (n, 0, 0)),    # shift_n
            ],
            out_specs=pl.BlockSpec((1, C_pad, TL), lambda n, l: (n, 0, l)),
        ),
        compiler_params=pltpu.CompilerParams(
            dimension_semantics=("parallel", "parallel")),
    )(x_p, w_g_cast, inv_arr, shift)

    return out_p[:, :C, :L]


def prenorm_ref(x, gamma, beta, w, wb):
    # pure-JAX reference of GroupNorm(1, C) + pointwise conv
    xf = x.astype(jnp.float32)
    mean = jnp.mean(xf, axis=(1, 2), keepdims=True)
    var = jnp.mean((xf - mean) ** 2, axis=(1, 2), keepdims=True)
    xn = (xf - mean) * jax.lax.rsqrt(var + EPS)
    xn = xn * gamma[None, :, :] + beta[None, :, :]
    y = jnp.einsum("oc,ncl->nol", w, xn) + wb[None, :, :]
    return y.astype(x.dtype)


if __name__ == "__main__":
    N, C, L = 2, 4, 16  # small shapes: batch=2, channels(dim)=4, seq length=16

    key = jax.random.PRNGKey(0)
    kx, kg, kb, kw, kwb = jax.random.split(key, 5)

    x = jax.random.normal(kx, (N, C, L), dtype=jnp.float32)

    # GroupNorm affine params (PyTorch inits gamma=1, beta=0; perturb so the
    # affine path is actually exercised).
    gamma = (1.0 + 0.1 * jax.random.normal(kg, (C, 1))).astype(jnp.float32)
    beta = (0.1 * jax.random.normal(kb, (C, 1))).astype(jnp.float32)

    # fn = Conv1d(dim, dim, kernel_size=1) parameters.
    w = (jax.random.normal(kw, (C, C)) * 0.5).astype(jnp.float32)
    wb = (0.1 * jax.random.normal(kwb, (C, 1))).astype(jnp.float32)

    out = prenorm(x, gamma, beta, w, wb)
    out = jax.block_until_ready(out)

    ref = prenorm_ref(x, gamma, beta, w, wb)
    assert out.shape == (N, C, L)
    assert jnp.allclose(out, ref, rtol=1e-4, atol=1e-4), "mismatch vs reference"

    print("KERNEL_OK")
</pallas_src>

<mosaic_0001>
module attributes {stable_mosaic.version = 11 : i64} {
  func.func @_apply_kernel(%arg0: i32, %arg1: i32, %arg2: memref<1x128x16xf32, #tpu.memory_space<vmem>>, %arg3: memref<128x128xf32, #tpu.memory_space<vmem>>, %arg4: memref<1x1x1xf32, #tpu.memory_space<vmem>>, %arg5: memref<1x128x1xf32, #tpu.memory_space<vmem>>, %arg6: memref<1x128x16xf32, #tpu.memory_space<vmem>>) attributes {dimension_semantics = [#tpu.dimension_semantics<parallel>, #tpu.dimension_semantics<parallel>], iteration_bounds = array<i64: 2, 1>, scalar_prefetch = 0 : i64, scratch_operands = 0 : i64, tpu.core_type = #tpu.core_type<tc>, window_params = [{transform_indices = @transform_0, window_bounds = array<i64: 1, 128, 16>}, {pipeline_mode = #tpu.pipeline_mode<synchronous>, transform_indices = @transform_1, window_bounds = array<i64: 128, 128>}, {transform_indices = @transform_2, window_bounds = array<i64: 1, 1, 1>}, {transform_indices = @transform_3, window_bounds = array<i64: 1, 128, 1>}, {transform_indices = @transform_4, window_bounds = array<i64: 1, 128, 16>}]} {
    %c0 = arith.constant 0 : index
    %c0_0 = arith.constant 0 : index
    %c0_1 = arith.constant 0 : index
    %0 = vector.load %arg4[%c0, %c0_0, %c0_1] : memref<1x1x1xf32, #tpu.memory_space<vmem>>, vector<1x1x1xf32>
    %1 = vector.shape_cast %0 : vector<1x1x1xf32> to vector<1x1xf32>
    %c0_2 = arith.constant 0 : index
    %c0_3 = arith.constant 0 : index
    %2 = vector.load %arg3[%c0_2, %c0_3] : memref<128x128xf32, #tpu.memory_space<vmem>>, vector<128x128xf32>
    %3 = vector.broadcast %1 : vector<1x1xf32> to vector<128x128xf32>
    %4 = arith.mulf %2, %3 : vector<128x128xf32>
    %c0_4 = arith.constant 0 : index
    %c0_5 = arith.constant 0 : index
    %c0_6 = arith.constant 0 : index
    %5 = vector.load %arg2[%c0_4, %c0_5, %c0_6] : memref<1x128x16xf32, #tpu.memory_space<vmem>>, vector<1x128x16xf32>
    %6 = vector.shape_cast %5 : vector<1x128x16xf32> to vector<128x16xf32>
    %cst = arith.constant dense<0.000000e+00> : vector<128x16xf32>
    %7 = tpu.matmul %4, %6, %cst {dimension_numbers = #tpu.dot_dimension_numbers<[1], [0], [0], [1], [0, 0, 1, 1], [], []>} : vector<128x128xf32>, vector<128x16xf32>, vector<128x16xf32> -> vector<128x16xf32>
    %c0_7 = arith.constant 0 : index
    %c0_8 = arith.constant 0 : index
    %c0_9 = arith.constant 0 : index
    %8 = vector.load %arg5[%c0_7, %c0_8, %c0_9] : memref<1x128x1xf32, #tpu.memory_space<vmem>>, vector<1x128x1xf32>
    %9 = vector.shape_cast %8 : vector<1x128x1xf32> to vector<128x1xf32>
    %10 = vector.broadcast %9 : vector<128x1xf32> to vector<128x16xf32>
    %11 = arith.addf %7, %10 : vector<128x16xf32>
    %c0_10 = arith.constant 0 : index
    %c0_11 = arith.constant 0 : index
    %c0_12 = arith.constant 0 : index
    %12 = vector.load %arg6[%c0_10, %c0_11, %c0_12] : memref<1x128x16xf32, #tpu.memory_space<vmem>>, vector<1x128x16xf32>
    %13 = vector.shape_cast %12 : vector<1x128x16xf32> to vector<128x16xf32>
    %14 = vector.shape_cast %11 : vector<128x16xf32> to vector<1x128x16xf32>
    tpu.vector_store %arg6[%c0_10, %c0_11, %c0_12], %14 {strides = array<i32>} : memref<1x128x16xf32, #tpu.memory_space<vmem>>, vector<1x128x16xf32>,
    return
  }
  func.func @transform_0(%arg0: i32, %arg1: i32) -> (i32, i32, i32) {
    %c0_i32 = arith.constant 0 : i32
    %c0_i32_0 = arith.constant 0 : i32
    return %arg0, %c0_i32, %arg1 : i32, i32, i32
  }
  func.func @transform_1(%arg0: i32, %arg1: i32) -> (i32, i32) {
    %c0_i32 = arith.constant 0 : i32
    %c0_i32_0 = arith.constant 0 : i32
    %c0_i32_1 = arith.constant 0 : i32
    return %c0_i32, %c0_i32_0 : i32, i32
  }
  func.func @transform_2(%arg0: i32, %arg1: i32) -> (i32, i32, i32) {
    %c0_i32 = arith.constant 0 : i32
    %c0_i32_0 = arith.constant 0 : i32
    %c0_i32_1 = arith.constant 0 : i32
    return %arg0, %c0_i32, %c0_i32_0 : i32, i32, i32
  }
  func.func @transform_3(%arg0: i32, %arg1: i32) -> (i32, i32, i32) {
    %c0_i32 = arith.constant 0 : i32
    %c0_i32_0 = arith.constant 0 : i32
    %c0_i32_1 = arith.constant 0 : i32
    return %arg0, %c0_i32, %c0_i32_0 : i32, i32, i32
  }
  func.func @transform_4(%arg0: i32, %arg1: i32) -> (i32, i32, i32) {
    %c0_i32 = arith.constant 0 : i32
    %c0_i32_0 = arith.constant 0 : i32
    return %arg0, %c0_i32, %arg1 : i32, i32, i32
  }
}

module attributes {stable_mosaic.version = 11 : i64} {
  func.func @_stats_kernel(%arg0: i32, %arg1: i32, %arg2: memref<1x128x16xf32, #tpu.memory_space<vmem>>, %arg3: memref<1x1x1xf32, #tpu.memory_space<vmem>>, %arg4: memref<1x1x1xf32, #tpu.memory_space<vmem>>) attributes {dimension_semantics = [#tpu.dimension_semantics<parallel>, #tpu.dimension_semantics<arbitrary>], iteration_bounds = array<i64: 2, 1>, scalar_prefetch = 0 : i64, scratch_operands = 0 : i64, tpu.core_type = #tpu.core_type<tc>, window_params = [{transform_indices = @transform_0, window_bounds = array<i64: 1, 128, 16>}, {transform_indices = @transform_1, window_bounds = array<i64: 1, 1, 1>}, {transform_indices = @transform_2, window_bounds = array<i64: 1, 1, 1>}]} {
    %c0_i32 = arith.constant 0 : i32
    %0 = arith.cmpi eq, %arg1, %c0_i32 : i32
    %1 = arith.extui %0 : i1 to i32
    %c0_i32_0 = arith.constant 0 : i32
    %2 = arith.cmpi ne, %1, %c0_i32_0 : i32
    scf.if %2 {
      %cst_16 = arith.constant 0.000000e+00 : f32
      %28 = vector.broadcast %cst_16 : f32 to vector<1x1x1xf32>
      %c0_17 = arith.constant 0 : index
      %c0_18 = arith.constant 0 : index
      %c0_19 = arith.constant 0 : index
      %29 = vector.load %arg3[%c0_17, %c0_18, %c0_19] : memref<1x1x1xf32, #tpu.memory_space<vmem>>, vector<1x1x1xf32>
      tpu.vector_store %arg3[%c0_17, %c0_18, %c0_19], %28 {strides = array<i32>} : memref<1x1x1xf32, #tpu.memory_space<vmem>>, vector<1x1x1xf32>,
      %cst_20 = arith.constant 0.000000e+00 : f32
      %30 = vector.broadcast %cst_20 : f32 to vector<1x1x1xf32>
      %c0_21 = arith.constant 0 : index
      %c0_22 = arith.constant 0 : index
      %c0_23 = arith.constant 0 : index
      %31 = vector.load %arg4[%c0_21, %c0_22, %c0_23] : memref<1x1x1xf32, #tpu.memory_space<vmem>>, vector<1x1x1xf32>
      tpu.vector_store %arg4[%c0_21, %c0_22, %c0_23], %30 {strides = array<i32>} : memref<1x1x1xf32, #tpu.memory_space<vmem>>, vector<1x1x1xf32>,
    } else {
    }
    %c0 = arith.constant 0 : index
    %c0_1 = arith.constant 0 : index
    %c0_2 = arith.constant 0 : index
    %3 = vector.load %arg2[%c0, %c0_1, %c0_2] : memref<1x128x16xf32, #tpu.memory_space<vmem>>, vector<1x128x16xf32>
    %4 = vector.shape_cast %3 : vector<1x128x16xf32> to vector<128x16xf32>
    %c0_3 = arith.constant 0 : index
    %c0_4 = arith.constant 0 : index
    %c0_5 = arith.constant 0 : index
    %5 = vector.load %arg3[%c0_3, %c0_4, %c0_5] : memref<1x1x1xf32, #tpu.memory_space<vmem>>, vector<1x1x1xf32>
    %6 = vector.shape_cast %5 : vector<1x1x1xf32> to vector<1x1xf32>
    %7 = vector.shape_cast %4 : vector<128x16xf32> to vector<1x128x16xf32>
    %cst = arith.constant dense<0.000000e+00> : vector<1xf32>
    %8 = vector.multi_reduction <add>, %7, %cst [1, 2] : vector<1x128x16xf32> to vector<1xf32>
    %9 = vector.shape_cast %8 : vector<1xf32> to vector<1x1x1xf32>
    %10 = vector.extract %9[0, 0, 0] : f32 from vector<1x1x1xf32>
    %11 = vector.broadcast %10 : f32 to vector<1x1xf32>
    %12 = arith.addf %6, %11 : vector<1x1xf32>
    %c0_6 = arith.constant 0 : index
    %c0_7 = arith.constant 0 : index
    %c0_8 = arith.constant 0 : index
    %13 = vector.load %arg3[%c0_6, %c0_7, %c0_8] : memref<1x1x1xf32, #tpu.memory_space<vmem>>, vector<1x1x1xf32>
    %14 = vector.shape_cast %13 : vector<1x1x1xf32> to vector<1x1xf32>
    %15 = vector.shape_cast %12 : vector<1x1xf32> to vector<1x1x1xf32>
    tpu.vector_store %arg3[%c0_6, %c0_7, %c0_8], %15 {strides = array<i32>} : memref<1x1x1xf32, #tpu.memory_space<vmem>>, vector<1x1x1xf32>,
    %c0_9 = arith.constant 0 : index
    %c0_10 = arith.constant 0 : index
    %c0_11 = arith.constant 0 : index
    %16 = vector.load %arg4[%c0_9, %c0_10, %c0_11] : memref<1x1x1xf32, #tpu.memory_space<vmem>>, vector<1x1x1xf32>
    %17 = vector.shape_cast %16 : vector<1x1x1xf32> to vector<1x1xf32>
    %18 = arith.mulf %4, %4 : vector<128x16xf32>
    %19 = vector.shape_cast %18 : vector<128x16xf32> to vector<1x128x16xf32>
    %cst_12 = arith.constant dense<0.000000e+00> : vector<1xf32>
    %20 = vector.multi_reduction <add>, %19, %cst_12 [1, 2] : vector<1x128x16xf32> to vector<1xf32>
    %21 = vector.shape_cast %20 : vector<1xf32> to vector<1x1x1xf32>
    %22 = vector.extract %21[0, 0, 0] : f32 from vector<1x1x1xf32>
    %23 = vector.broadcast %22 : f32 to vector<1x1xf32>
    %24 = arith.addf %17, %23 : vector<1x1xf32>
    %c0_13 = arith.constant 0 : index
    %c0_14 = arith.constant 0 : index
    %c0_15 = arith.constant 0 : index
    %25 = vector.load %arg4[%c0_13, %c0_14, %c0_15] : memref<1x1x1xf32, #tpu.memory_space<vmem>>, vector<1x1x1xf32>
    %26 = vector.shape_cast %25 : vector<1x1x1xf32> to vector<1x1xf32>
    %27 = vector.shape_cast %24 : vector<1x1xf32> to vector<1x1x1xf32>
    tpu.vector_store %arg4[%c0_13, %c0_14, %c0_15], %27 {strides = array<i32>} : memref<1x1x1xf32, #tpu.memory_space<vmem>>, vector<1x1x1xf32>,
    return
  }
  func.func @transform_0(%arg0: i32, %arg1: i32) -> (i32, i32, i32) {
    %c0_i32 = arith.constant 0 : i32
    %c0_i32_0 = arith.constant 0 : i32
    return %arg0, %c0_i32, %arg1 : i32, i32, i32
  }
  func.func @transform_1(%arg0: i32, %arg1: i32) -> (i32, i32, i32) {
    %c0_i32 = arith.constant 0 : i32
    %c0_i32_0 = arith.constant 0 : i32
    %c0_i32_1 = arith.constant 0 : i32
    return %arg0, %c0_i32, %c0_i32_0 : i32, i32, i32
  }
  func.func @transform_2(%arg0: i32, %arg1: i32) -> (i32, i32, i32) {
    %c0_i32 = arith.constant 0 : i32
    %c0_i32_0 = arith.constant 0 : i32
    %c0_i32_1 = arith.constant 0 : i32
    return %arg0, %c0_i32, %c0_i32_0 : i32, i32, i32
  }
}

</mosaic_0001>

<bundles_post_ra>
// kernel: prenorm.2
= control target key start
LH: loop header
LB: loop body
LE: loop exit
PB: predicated region body
PF: predicated region fallthrough
CT: control target
= control target key end

     0   :  { %s466_s9 = smov 0   ;;  %s468_s10 = smov 0   ;;  %s561_s0 = inlined_call_operand.vmem [shape: f32[2,128,16], index: 0, kind: input, shape index: {}]   ;;  %s562_s1 = inlined_call_operand.vmem [shape: f32[2,1,1], index: 1, kind: output, shape index: {0}]   ;;  %s563_s2 = inlined_call_operand.vmem [shape: f32[2,1,1], index: 2, kind: output, shape index: {1}]  }
   0x1   :  { %s470_s11 = smov 0  }
   0x2 LB: > { %s25_s12 = sadd.s32 1, %s444_s10  ;;  %p391_p0 = scmp.ge.s32.totalorder %s448_s11, 1  ;;  %s448_s11 = sphi %s470_s11, %s13_s11   ;;  %s444_s10 = sphi %s468_s10, %s565_s10   ;;  %s440_s9 = sphi %s466_s9, %s564_s9  }
   0x3   : > { %p27_p1 = scmp.ge.s32.totalorder %s25_s12, 2  ;;  %p132_p2 = scmp.lt.s32.totalorder %s448_s11, 3 }
   0x5   : > { %s567_s12 = smov (%p27_p1, %s25_s12), 0  ;;  %p133_p3 = pnand %p391_p0, %p132_p2 }
   0x6   : > { %p158_p4 = scmp.lt.s32.totalorder (!%p133_p3), %s440_s9, 1 }
   0x7   : > { %136 = sbr.rel (%p133_p3) target bundleno = 255 (0xff), region = 24 }
   0xc   : > { %s569_s9 = smov (!%p158_p4, %s440_s9), 1  ;;  %vm196_vm0 = vcmask 130048   ;;  %vm176_vm1 = vcmask 0  }
   0xd   : > { %s396_s13 = sshll.u32 %s569_s9, 7  ;;  %s168_s19 = scalar_lea.vmem %s562_s1, %s569_s9 }
   0xe   : > { %s490_s16 = scalar_lea.vmem %s561_s0, %s396_s13  ;;  %s171_s22 = scalar_lea.vmem %s563_s2, %s569_s9 }
   0xf   : > { %v179_v0 = vld [vmem:[%s490_s16] sm:$0xff]  ;;  %v180_v1 = vld [vmem:[%s490_s16 + $0x8] sm:$0xff]  ;;  %v181_v2 = vld [vmem:[%s490_s16 + $0x10] sm:$0xff] }
  0x10   : > { %v182_v3 = vld [vmem:[%s490_s16 + $0x18] sm:$0xff]  ;;  %v197_v4 = vsel %vm196_vm0, %v179_v0, 0.0  ;;  %v198_v5 = vsel %vm196_vm0, %v180_v1, 0.0  ;;  %v200_v6 = vsel %vm196_vm0, %v181_v2, 0.0  ;;  %v183_v7 = vld [vmem:[%s490_s16 + $0x20] sm:$0xff]  ;;  %v184_v10 = vld [vmem:[%s490_s16 + $0x28] sm:$0xff]  ;;  %v242_v15 = vmul.f32 %v179_v0, %v179_v0 }
  0x11   : > { %v199_v8 = vadd.f32 %v198_v5, %v197_v4  ;;  %v202_v9 = vsel %vm196_vm0, %v182_v3, 0.0  ;;  %v204_v12 = vsel %vm196_vm0, %v183_v7, 0.0  ;;  %v185_v13 = vld [vmem:[%s490_s16 + $0x30] sm:$0xff]  ;;  %v243_v16 = vmul.f32 %v180_v1, %v180_v1  ;;  %v186_v19 = vld [vmem:[%s490_s16 + $0x38] sm:$0xff]  ;;  %v187_v24 = vld [vmem:[%s490_s16 + $0x40] sm:$0xff] }
  0x12   : > { %v244_v17 = vmul.f32 %v181_v2, %v181_v2  ;;  %v206_v18 = vsel %vm196_vm0, %v184_v10, 0.0  ;;  %v245_v21 = vmul.f32 %v182_v3, %v182_v3  ;;  %v208_v22 = vsel %vm196_vm0, %v185_v13, 0.0  ;;  %v188_v31 = vld [vmem:[%s490_s16 + $0x48] sm:$0xff]  ;;  %v189_v37 = vld [vmem:[%s490_s16 + $0x50] sm:$0xff]  ;;  %v190_v43 = vld [vmem:[%s490_s16 + $0x58] sm:$0xff] }
  0x13   : > { %v201_v11 = vadd.f32 %v200_v6, %v199_v8  ;;  %v246_v23 = vmul.f32 %v183_v7, %v183_v7  ;;  %v258_v26 = vsel %vm196_vm0, %v242_v15, 0.0  ;;  %v259_v27 = vsel %vm196_vm0, %v243_v16, 0.0  ;;  %v191_v49 = vld [vmem:[%s490_s16 + $0x60] sm:$0xff]  ;;  %v192_v55 = vld [vmem:[%s490_s16 + $0x68] sm:$0xff]  ;;  %v193_v61 = vld [vmem:[%s490_s16 + $0x70] sm:$0xff] }
  0x14   : > { %v261_v28 = vsel %vm196_vm0, %v244_v17, 0.0  ;;  %v210_v29 = vsel %vm196_vm0, %v186_v19, 0.0  ;;  %v260_v30 = vadd.f32 %v259_v27, %v258_v26  ;;  %v247_v33 = vmul.f32 %v184_v10, %v184_v10  ;;  %v194_v3 = vld [vmem:[%s490_s16 + $0x78] sm:$0xff] }
  0x15   : > { %v203_v14 = vadd.f32 %v202_v9, %v201_v11  ;;  %v263_v34 = vsel %vm196_vm0, %v245_v21, 0.0  ;;  %v212_v35 = vsel %vm196_vm0, %v187_v24, 0.0  ;;  %v248_v39 = vmul.f32 %v185_v13, %v185_v13 }
  0x16   : > { %v262_v36 = vadd.f32 %v261_v28, %v260_v30  ;;  %v265_v40 = vsel %vm196_vm0, %v246_v23, 0.0  ;;  %v214_v41 = vsel %vm196_vm0, %v188_v31, 0.0  ;;  %v249_v45 = vmul.f32 %v186_v19, %v186_v19 }
  0x17   : > { %v205_v20 = vadd.f32 %v204_v12, %v203_v14  ;;  %v267_v46 = vsel %vm196_vm0, %v247_v33, 0.0  ;;  %v216_v47 = vsel %vm196_vm0, %v189_v37, 0.0  ;;  %v250_v51 = vmul.f32 %v187_v24, %v187_v24 }
  0x18   : > { %v264_v42 = vadd.f32 %v263_v34, %v262_v36  ;;  %v269_v52 = vsel %vm196_vm0, %v248_v39, 0.0  ;;  %v218_v53 = vsel %vm196_vm0, %v190_v43, 0.0  ;;  %v251_v57 = vmul.f32 %v188_v31, %v188_v31 }
  0x19   : > { %v207_v25 = vadd.f32 %v206_v18, %v205_v20  ;;  %v271_v58 = vsel %vm196_vm0, %v249_v45, 0.0  ;;  %v220_v59 = vsel %vm196_vm0, %v191_v49, 0.0  ;;  %v252_v63 = vmul.f32 %v189_v37, %v189_v37 }
  0x1a   : > { %v266_v48 = vadd.f32 %v265_v40, %v264_v42  ;;  %v273_v0 = vsel %vm196_vm0, %v250_v51, 0.0  ;;  %v222_v1 = vsel %vm196_vm0, %v192_v55, 0.0  ;;  %v253_v5 = vmul.f32 %v190_v43, %v190_v43 }
  0x1b   : > { %v209_v32 = vadd.f32 %v208_v22, %v207_v25  ;;  %v275_v6 = vsel %vm196_vm0, %v251_v57, 0.0  ;;  %v224_v7 = vsel %vm196_vm0, %v193_v61, 0.0  ;;  %v254_v10 = vmul.f32 %v191_v49, %v191_v49 }
  0x1c   : > { %v268_v54 = vadd.f32 %v267_v46, %v266_v48  ;;  %v277_v11 = vsel %vm196_vm0, %v252_v63, 0.0  ;;  %v226_v12 = vsel %vm196_vm0, %v194_v3, 0.0  ;;  %v255_v15 = vmul.f32 %v192_v55, %v192_v55 }
  0x1d   : > { %v211_v38 = vadd.f32 %v210_v29, %v209_v32  ;;  %v279_v16 = vsel %vm196_vm0, %v253_v5, 0.0  ;;  %v256_v19 = vmul.f32 %v193_v61, %v193_v61  ;;  %v281_v20 = vsel %vm196_vm0, %v254_v10, 0.0 }
  0x1e   : > { %v270_v60 = vadd.f32 %v269_v52, %v268_v54  ;;  %v257_v22 = vmul.f32 %v194_v3, %v194_v3  ;;  %v283_v23 = vsel %vm196_vm0, %v255_v15, 0.0  ;;  %v450_v30 = vmov 0.0  }
  0x1f   : > { %v213_v44 = vadd.f32 %v212_v35, %v211_v38  ;;  %v285_v25 = vsel %vm196_vm0, %v256_v19, 0.0  ;;  %177 = vst.msk [vmem:[%s168_s19] sm:$0x1] %vm176_vm1, %v450_v30  ;;  %178 = vst.msk [vmem:[%s171_s22] sm:$0x1] %vm176_vm1, %v450_v30 }
  0x20   : > { %v272_v2 = vadd.f32 %v271_v58, %v270_v60  ;;  %v287_v27 = vsel %vm196_vm0, %v257_v22, 0.0 }
  0x21   : > { %v215_v50 = vadd.f32 %v214_v41, %v213_v44 }
  0x22   : > { %v274_v8 = vadd.f32 %v273_v0, %v272_v2 }
  0x23   : > { %v217_v56 = vadd.f32 %v216_v47, %v215_v50 }
  0x24   : > { %v276_v13 = vadd.f32 %v275_v6, %v274_v8 }
  0x25   : > { %v219_v62 = vadd.f32 %v218_v53, %v217_v56 }
  0x26   : > { %v278_v17 = vadd.f32 %v277_v11, %v276_v13  ;;  %v195_v45 = vld [vmem:[%s168_s19] sm:$0x1] }
  0x27   : > { %v221_v4 = vadd.f32 %v220_v59, %v219_v62  ;;  %v241_v48 = vld [vmem:[%s171_s22] sm:$0x1] }
  0x28   : > { %v280_v21 = vadd.f32 %v279_v16, %v278_v17 }
  0x29   : > { %v223_v9 = vadd.f32 %v222_v1, %v221_v4 }
  0x2a   : > { %v282_v24 = vadd.f32 %v281_v20, %v280_v21 }
  0x2b   : > { %v225_v14 = vadd.f32 %v224_v7, %v223_v9 }
  0x2c   : > { %v284_v26 = vadd.f32 %v283_v23, %v282_v24 }
  0x2d   : > { %v227_v18 = vadd.f32 %v226_v12, %v225_v14 }
  0x2e   : > { %v286_v28 = vadd.f32 %v285_v25, %v284_v26 }
  0x2f   : > { %228 = vadd.xlane.f32.xlu0 %v227_v18 }
  0x30   : > { %v288_v29 = vadd.f32 %v287_v27, %v286_v28 }
  0x33   : > { %289 = vadd.xlane.f32.xlu0 %v288_v29 }
  0xb8   : > { %v229_v31 = vpop.xlane.xlu0 %228 }
  0xb9   : > { %v230_v32 = vrot.slane %v229_v31, 4 }
  0xbb   : > { %v231_v33 = vadd.f32 %v230_v32, %v229_v31 }
  0xbc   : > { %v290_v36 = vpop.xlane.xlu0 %289 }
  0xbd   : > { %v232_v34 = vrot.slane %v231_v33, 2  ;;  %v291_v38 = vrot.slane %v290_v36, 4 }
  0xbf   : > { %v233_v35 = vadd.f32 %v232_v34, %v231_v33  ;;  %v292_v40 = vadd.f32 %v291_v38, %v290_v36 }
  0xc1   : > { %v234_v37 = vrot.slane %v233_v35, 1  ;;  %v293_v41 = vrot.slane %v292_v40, 2 }
  0xc3   : > { %v235_v39 = vadd.f32 %v234_v37, %v233_v35  ;;  %v294_v42 = vadd.f32 %v293_v41, %v292_v40 }
  0xc5   : > { %397 = vpush %v235_v39  ;;  %v295_v43 = vrot.slane %v294_v42, 1 }
  0xc7   : > { %v296_v44 = vadd.f32 %v295_v43, %v294_v42 }
  0xc9   : > { %399 = vpush %v296_v44 }
  0xf6   : > { %s398_s23 = spop %397 }
  0xf7   : > { %v237_v46 = vstv %s398_s23 }
  0xf8   : > { %v238_v47 = vadd.f32 %v237_v46, %v195_v45 }
  0xfa   : > { %240 = vst.msk [vmem:[%s168_s19] sm:$0x1] %vm176_vm1, %v238_v47  ;;  %s400_s24 = spop %399 }
  0xfb   : > { %v298_v49 = vstv %s400_s24 }
  0xfc   : > { %v299_v50 = vadd.f32 %v298_v49, %v241_v48 }
  0xfe   : > { %300 = vst.msk [vmem:[%s171_s22] sm:$0x1] %vm176_vm1, %v299_v50 }
  0xff PF: > { %s13_s11 = sadd.s32 1, %s448_s11   ;;  %s564_s9 = smov %s444_s10 }
 0x100   : > { %p10_p5 = scmp.ge.s32.totalorder %s13_s11, 4   ;;  %s565_s10 = smov %s567_s12 }
 0x102   :  { %12 = sbr.rel (!%p10_p5) target bundleno = 2 (0x2), region = 70 }

// kernel: prenorm.3
= control target key start
LH: loop header
LB: loop body
LE: loop exit
PB: predicated region body
PF: predicated region fallthrough
CT: control target
= control target key end

     0   :  { %s897_s15 = smov 0   ;;  %s899_s16 = smov 0   ;;  %s1059_s0 = inlined_call_operand.vmem [shape: f32[2,128,16], index: 0, kind: input, shape index: {}]   ;;  %s1060_s1 = inlined_call_operand.vmem [shape: f32[128,128], index: 1, kind: input, shape index: {}]   ;;  %s1061_s2 = inlined_call_operand.vmem [shape: f32[2,1,1], index: 2, kind: input, shape index: {}]   ;;  %s1062_s3 = inlined_call_operand.vmem [shape: f32[2,128,1], index: 3, kind: input, shape index: {}]   ;;  %s1063_s4 = inlined_call_operand.vmem [shape: f32[2,128,16], index: 4, kind: output, shape index: {}]  }
   0x1   :  { %s901_s17 = smov 0  }
   0x2 LB: > { %s26_s18 = sadd.s32 1, %s865_s16  ;;  %p687_p0 = scmp.ge.s32.totalorder %s869_s17, 1  ;;  %s869_s17 = sphi %s901_s17, %s14_s17   ;;  %s865_s16 = sphi %s899_s16, %s1065_s16   ;;  %s861_s15 = sphi %s897_s15, %s1064_s15  }
   0x3   : > { %p28_p1 = scmp.ge.s32.totalorder %s26_s18, 2  ;;  %p199_p2 = scmp.lt.s32.totalorder %s869_s17, 3 }
   0x5   : > { %s1067_s18 = smov (%p28_p1, %s26_s18), 0  ;;  %p200_p3 = pnand %p687_p0, %p199_p2 }
   0x6   : > { %p239_p4 = scmp.lt.s32.totalorder (!%p200_p3), %s861_s15, 1 }
   0x7   : > { %203 = sbr.rel (%p200_p3) target bundleno = 352 (0x160), region = 36 }
   0xc   : > { %v871_v0 = vmov 0   ;;  %s1069_s15 = smov (!%p239_p4, %s861_s15), 1  ;;  %v264_v34 = vld [vmem:[%s1060_s1] sm:$0xff]  ;;  %v265_v36 = vld [vmem:[%s1060_s1 + $0x8] sm:$0xff]  ;;  %v266_v39 = vld [vmem:[%s1060_s1 + $0x10] sm:$0xff]  ;;  %vm562_vm0 = vcmask 130048  }
   0xd   : > { %845 = vset.pattern.permute.xlu0 %v871_v0  ;;  %846 = vset.pattern.permute.xlu1 %v871_v0  ;;  %s249_s21 = scalar_lea.vmem %s1061_s2, %s1069_s15  ;;  %s918_s22 = sshll.u32 %s1069_s15, 7  ;;  %v272_v35 = vld [vmem:[%s1060_s1 + $0x40] sm:$0xff]  ;;  %v273_v37 = vld [vmem:[%s1060_s1 + $0x48] sm:$0xff]  ;;  %v274_v40 = vld [vmem:[%s1060_s1 + $0x50] sm:$0xff] }
   0xe   : > { %v694_v1 = vld [vmem:[%s249_s21] ss:$0 sm:$0xff]  ;;  %s924_s25 = scalar_lea.vmem %s1059_s0, %s918_s22  ;;  %s930_s28 = scalar_lea.vmem %s1062_s3, %s918_s22  ;;  %v267_v47 = vld [vmem:[%s1060_s1 + $0x18] sm:$0xff]  ;;  %v269_v55 = vld [vmem:[%s1060_s1 + $0x28] sm:$0xff] }
   0xf   : > { %286 = vperm.xlu0 %845, %v694_v1   ;;  %v321_v2 = vld [vmem:[%s930_s28] sm:$0xff]  ;;  %v320_v3 = vld [vmem:[%s924_s25 + $0x78] sm:$0xff]  ;;  %v319_v4 = vld [vmem:[%s924_s25 + $0x70] sm:$0xff]  ;;  %s1016_s15 = scalar_lea.vmem %s1063_s4, %s918_s22 }
  0x10   : > { %732 = vmatprep.subr.mxu0 %v320_v3  ;;  %788 = vmatprep.subr.mxu1 %v320_v3  ;;  %v318_v5 = vld [vmem:[%s924_s25 + $0x68] sm:$0xff]  ;;  %v324_v6 = vld [vmem:[%s930_s28 + $0x18] sm:$0xff]  ;;  %v317_v7 = vld [vmem:[%s924_s25 + $0x60] sm:$0xff] }
  0x11   : > { %733 = vmatpush3.msra.mxu0 %v320_v3  ;;  %804 = vmatpush3.msra.mxu1 %v320_v3  ;;  %v326_v8 = vld [vmem:[%s930_s28 + $0x28] sm:$0xff]  ;;  %v316_v9 = vld [vmem:[%s924_s25 + $0x58] sm:$0xff]  ;;  %v315_v10 = vld [vmem:[%s924_s25 + $0x50] sm:$0xff] }
  0x12   : > { %734 = vmatprep.subr.mxu0 %v319_v4  ;;  %789 = vmatprep.subr.mxu1 %v319_v4  ;;  %v328_v11 = vld [vmem:[%s930_s28 + $0x38] sm:$0xff]  ;;  %v314_v12 = vld [vmem:[%s924_s25 + $0x48] sm:$0xff]  ;;  %v313_v13 = vld [vmem:[%s924_s25 + $0x40] sm:$0xff] }
  0x13   : > { %339 = vperm.xlu0 %845, %v321_v2   ;;  %735 = vmatpush3.msra.mxu0 %v319_v4  ;;  %v330_v14 = vld [vmem:[%s930_s28 + $0x48] sm:$0xff]  ;;  %v312_v15 = vld [vmem:[%s924_s25 + $0x38] sm:$0xff]  ;;  %v311_v16 = vld [vmem:[%s924_s25 + $0x30] sm:$0xff] }
  0x14   : > { %805 = vmatpush3.msra.mxu1 %v319_v4  ;;  %736 = vmatprep.subr.mxu0 %v318_v5  ;;  %v332_v17 = vld [vmem:[%s930_s28 + $0x58] sm:$0xff]  ;;  %v310_v18 = vld [vmem:[%s924_s25 + $0x28] sm:$0xff]  ;;  %v309_v20 = vld [vmem:[%s924_s25 + $0x20] sm:$0xff] }
  0x15   : > { %790 = vmatprep.subr.mxu1 %v318_v5  ;;  %737 = vmatpush3.msra.mxu0 %v318_v5  ;;  %v334_v19 = vld [vmem:[%s930_s28 + $0x68] sm:$0xff]  ;;  %v308_v21 = vld [vmem:[%s924_s25 + $0x18] sm:$0xff]  ;;  %v307_v23 = vld [vmem:[%s924_s25 + $0x10] sm:$0xff] }
  0x16   : > { %806 = vmatpush3.msra.mxu1 %v318_v5  ;;  %738 = vmatprep.subr.mxu0 %v317_v7  ;;  %v336_v22 = vld [vmem:[%s930_s28 + $0x78] sm:$0xff]  ;;  %v306_v24 = vld [vmem:[%s924_s25 + $0x8] sm:$0xff]  ;;  %v305_v25 = vld [vmem:[%s924_s25] sm:$0xff] }
  0x17   : > { %354 = vperm.xlu0 %845, %v324_v6   ;;  %791 = vmatprep.subr.mxu1 %v317_v7  ;;  %v322_v26 = vld [vmem:[%s930_s28 + $0x8] sm:$0xff]  ;;  %v323_v27 = vld [vmem:[%s930_s28 + $0x10] sm:$0xff]  ;;  %v325_v28 = vld [vmem:[%s930_s28 + $0x20] sm:$0xff] }
  0x18   : > { %739 = vmatpush3.msra.mxu0 %v317_v7  ;;  %807 = vmatpush3.msra.mxu1 %v317_v7  ;;  %v327_v29 = vld [vmem:[%s930_s28 + $0x30] sm:$0xff]  ;;  %v329_v30 = vld [vmem:[%s930_s28 + $0x40] sm:$0xff]  ;;  %v275_v48 = vld [vmem:[%s1060_s1 + $0x58] sm:$0xff] }
  0x19   : > { %740 = vmatprep.subr.mxu0 %v316_v9  ;;  %792 = vmatprep.subr.mxu1 %v316_v9  ;;  %v331_v31 = vld [vmem:[%s930_s28 + $0x50] sm:$0xff]  ;;  %v333_v32 = vld [vmem:[%s930_s28 + $0x60] sm:$0xff]  ;;  %v277_v56 = vld [vmem:[%s1060_s1 + $0x68] sm:$0xff] }
  0x1a   : > { %741 = vmatpush3.msra.mxu0 %v316_v9  ;;  %808 = vmatpush3.msra.mxu1 %v316_v9  ;;  %v335_v33 = vld [vmem:[%s930_s28 + $0x70] sm:$0xff]  ;;  %v268_v49 = vld [vmem:[%s1060_s1 + $0x20] sm:$0xff]  ;;  %v271_v63 = vld [vmem:[%s1060_s1 + $0x38] sm:$0xff] }
  0x1b   : > { %364 = vperm.xlu0 %845, %v326_v8   ;;  %742 = vmatprep.subr.mxu0 %v315_v10  ;;  %v276_v50 = vld [vmem:[%s1060_s1 + $0x60] sm:$0xff]  ;;  %v270_v57 = vld [vmem:[%s1060_s1 + $0x30] sm:$0xff]  ;;  %v279_v0 = vld [vmem:[%s1060_s1 + $0x78] sm:$0xff] }
  0x1c   : > { %793 = vmatprep.subr.mxu1 %v315_v10  ;;  %743 = vmatpush3.msra.mxu0 %v315_v10  ;;  %v278_v58 = vld [vmem:[%s1060_s1 + $0x70] sm:$0xff] }
  0x1d   : > { %809 = vmatpush3.msra.mxu1 %v315_v10  ;;  %744 = vmatprep.subr.mxu0 %v314_v12 }
  0x1e   : > { %794 = vmatprep.subr.mxu1 %v314_v12  ;;  %745 = vmatpush3.msra.mxu0 %v314_v12 }
  0x1f   : > { %374 = vperm.xlu0 %845, %v328_v11   ;;  %810 = vmatpush3.msra.mxu1 %v314_v12 }
  0x20   : > { %746 = vmatprep.subr.mxu0 %v313_v13  ;;  %795 = vmatprep.subr.mxu1 %v313_v13 }
  0x21   : > { %747 = vmatpush3.msra.mxu0 %v313_v13  ;;  %811 = vmatpush3.msra.mxu1 %v313_v13 }
  0x22   : > { %748 = vmatprep.subr.mxu0 %v312_v15  ;;  %796 = vmatprep.subr.mxu1 %v312_v15 }
  0x23   : > { %384 = vperm.xlu0 %845, %v330_v14   ;;  %749 = vmatpush3.msra.mxu0 %v312_v15 }
  0x24   : > { %812 = vmatpush3.msra.mxu1 %v312_v15  ;;  %750 = vmatprep.subr.mxu0 %v311_v16 }
  0x25   : > { %797 = vmatprep.subr.mxu1 %v311_v16  ;;  %751 = vmatpush3.msra.mxu0 %v311_v16 }
  0x26   : > { %813 = vmatpush3.msra.mxu1 %v311_v16  ;;  %752 = vmatprep.subr.mxu0 %v310_v18 }
  0x27   : > { %394 = vperm.xlu0 %845, %v332_v17   ;;  %798 = vmatprep.subr.mxu1 %v310_v18 }
  0x28   : > { %753 = vmatpush3.msra.mxu0 %v310_v18  ;;  %814 = vmatpush3.msra.mxu1 %v310_v18 }
  0x29   : > { %754 = vmatprep.subr.mxu0 %v309_v20  ;;  %799 = vmatprep.subr.mxu1 %v309_v20 }
  0x2a   : > { %755 = vmatpush3.msra.mxu0 %v309_v20  ;;  %815 = vmatpush3.msra.mxu1 %v309_v20 }
  0x2b   : > { %404 = vperm.xlu0 %845, %v334_v19   ;;  %756 = vmatprep.subr.mxu0 %v308_v21 }
  0x2c   : > { %800 = vmatprep.subr.mxu1 %v308_v21  ;;  %757 = vmatpush3.msra.mxu0 %v308_v21 }
  0x2d   : > { %816 = vmatpush3.msra.mxu1 %v308_v21  ;;  %758 = vmatprep.subr.mxu0 %v307_v23 }
  0x2e   : > { %801 = vmatprep.subr.mxu1 %v307_v23  ;;  %759 = vmatpush3.msra.mxu0 %v307_v23 }
  0x2f   : > { %414 = vperm.xlu0 %845, %v336_v22   ;;  %817 = vmatpush3.msra.mxu1 %v307_v23 }
  0x30   : > { %760 = vmatprep.subr.mxu0 %v306_v24  ;;  %802 = vmatprep.subr.mxu1 %v306_v24 }
  0x31   : > { %761 = vmatpush3.msra.mxu0 %v306_v24  ;;  %818 = vmatpush3.msra.mxu1 %v306_v24 }
  0x32   : > { %762 = vmatprep.subr.mxu0 %v305_v25  ;;  %803 = vmatprep.subr.mxu1 %v305_v25 }
  0x33   : > { %763 = vmatpush3.msra.mxu0 %v305_v25  ;;  %819 = vmatpush3.msra.mxu1 %v305_v25 }
  0x34   : > { %344 = vperm.xlu1 %846, %v322_v26  }
  0x38   : > { %349 = vperm.xlu1 %846, %v323_v27  }
  0x3c   : > { %359 = vperm.xlu1 %846, %v325_v28  }
  0x40   : > { %369 = vperm.xlu1 %846, %v327_v29  }
  0x44   : > { %379 = vperm.xlu1 %846, %v329_v30  }
  0x48   : > { %389 = vperm.xlu1 %846, %v331_v31  }
  0x4c   : > { %399 = vperm.xlu1 %846, %v333_v32  }
  0x50   : > { %409 = vperm.xlu1 %846, %v335_v33  }
  0x8a   : > { %v287_v38 = vpop.permute.xlu0 %286 }
  0x8b   : > { %v289_v41 = vmul.f32 %v287_v38, %v264_v34  ;;  %v297_v42 = vmul.f32 %v287_v38, %v272_v35  ;;  %v290_v43 = vmul.f32 %v287_v38, %v265_v36  ;;  %v298_v44 = vmul.f32 %v287_v38, %v273_v37 }
  0x8c   : > { %v291_v45 = vmul.f32 %v287_v38, %v266_v39  ;;  %v299_v46 = vmul.f32 %v287_v38, %v274_v40  ;;  %v292_v51 = vmul.f32 %v287_v38, %v267_v47  ;;  %v300_v52 = vmul.f32 %v287_v38, %v275_v48 }
  0x8d   : > { %764 = vmatprep.mubr.f32.mxu0 %v289_v41  ;;  %776 = vmatprep.mubr.f32.mxu1 %v297_v42  ;;  %v293_v53 = vmul.f32 %v287_v38, %v268_v49  ;;  %v301_v54 = vmul.f32 %v287_v38, %v276_v50  ;;  %v294_v59 = vmul.f32 %v287_v38, %v269_v55 }
  0x8e   : > { %765 = vmatmul.mubr.f32.vlgmr.msra.gmra.mxu0 %v290_v43  ;;  %777 = vmatmul.mubr.f32.vlgmr.msra.gmra.mxu1 %v298_v44  ;;  %v302_v60 = vmul.f32 %v287_v38, %v277_v56  ;;  %v295_v61 = vmul.f32 %v287_v38, %v270_v57  ;;  %v303_v62 = vmul.f32 %v287_v38, %v278_v58  ;;  %v340_v3 = vpop.permute.xlu0 %339 }
  0x8f   : > { %767 = vmatprep.mubr.f32.mxu0 %v291_v45  ;;  %779 = vmatprep.mubr.f32.mxu1 %v299_v46  ;;  %v296_v1 = vmul.f32 %v287_v38, %v271_v63  ;;  %v304_v2 = vmul.f32 %v287_v38, %v279_v0 }
  0x92   : > { %768 = vmatmul.mubr.f32.gmra.mxu0 %v292_v51  ;;  %780 = vmatmul.mubr.f32.gmra.mxu1 %v300_v52  ;;  %v355_v5 = vpop.permute.xlu0 %354 }
  0x93   : > { %770 = vmatprep.mubr.f32.mxu0 %v293_v53  ;;  %782 = vmatprep.mubr.f32.mxu1 %v301_v54 }
  0x96   : > { %771 = vmatmul.mubr.f32.gmra.mxu0 %v294_v59  ;;  %783 = vmatmul.mubr.f32.gmra.mxu1 %v302_v60  ;;  %v365_v7 = vpop.permute.xlu0 %364 }
  0x97   : > { %773 = vmatprep.mubr.f32.mxu0 %v295_v61  ;;  %785 = vmatprep.mubr.f32.mxu1 %v303_v62 }
  0x9a   : > { %774 = vmatmul.mubr.f32.gmra.mxu0 %v296_v1  ;;  %786 = vmatmul.mubr.f32.gmra.mxu1 %v304_v2  ;;  %v375_v9 = vpop.permute.xlu0 %374 }
  0x9e   : > { %v385_v11 = vpop.permute.xlu0 %384 }
  0xa2   : > { %v395_v13 = vpop.permute.xlu0 %394 }
  0xa6   : > { %v405_v25 = vpop.permute.xlu0 %404 }
  0xaa   : > { %v415_v39 = vpop.permute.xlu0 %414 }
  0xaf   : > { %v345_v4 = vpop.permute.xlu1 %344 }
  0xb3   : > { %v350_v6 = vpop.permute.xlu1 %349 }
  0xb7   : > { %v360_v8 = vpop.permute.xlu1 %359 }
  0xbb   : > { %v370_v10 = vpop.permute.xlu1 %369 }
  0xbf   : > { %v380_v12 = vpop.permute.xlu1 %379 }
  0xc3   : > { %v390_v16 = vpop.permute.xlu1 %389 }
  0xc7   : > { %v400_v30 = vpop.permute.xlu1 %399 }
  0xcb   : > { %v410_v44 = vpop.permute.xlu1 %409 }
 0x14e   : > { %v766_v14 = vpop.f32.mrf.mxu0  ;;  %v778_v15 = vpop.f32.mrf.mxu1 }
 0x14f   : > { %v489_v17 = vadd.f32 %v766_v14, %v345_v4  ;;  %v529_v18 = vadd.f32 %v778_v15, %v385_v11 }
 0x150   : > { %v483_v19 = vpop.f32.mrf.mxu0  ;;  %v523_v20 = vpop.f32.mrf.mxu1 }
 0x151   : > { %564 = vst.msk [vmem:[%s1016_s15 + $0x8] sm:$0xff] %vm562_vm0, %v489_v17  ;;  %572 = vst.msk [vmem:[%s1016_s15 + $0x48] sm:$0xff] %vm562_vm0, %v529_v18  ;;  %v484_v21 = vadd.f32 %v483_v19, %v340_v3  ;;  %v524_v22 = vadd.f32 %v523_v20, %v380_v12 }
 0x152   : > { %v769_v23 = vpop.f32.mrf.mxu0  ;;  %v781_v24 = vpop.f32.mrf.mxu1 }
 0x153   : > { %563 = vst.msk [vmem:[%s1016_s15] sm:$0xff] %vm562_vm0, %v484_v21  ;;  %571 = vst.msk [vmem:[%s1016_s15 + $0x40] sm:$0xff] %vm562_vm0, %v524_v22  ;;  %v499_v26 = vadd.f32 %v769_v23, %v355_v5  ;;  %v539_v27 = vadd.f32 %v781_v24, %v395_v13 }
 0x154   : > { %v493_v28 = vpop.f32.mrf.mxu0  ;;  %v533_v29 = vpop.f32.mrf.mxu1 }
 0x155   : > { %566 = vst.msk [vmem:[%s1016_s15 + $0x18] sm:$0xff] %vm562_vm0, %v499_v26  ;;  %574 = vst.msk [vmem:[%s1016_s15 + $0x58] sm:$0xff] %vm562_vm0, %v539_v27  ;;  %v494_v31 = vadd.f32 %v493_v28, %v350_v6  ;;  %v534_v32 = vadd.f32 %v533_v29, %v390_v16 }
 0x156   : > { %v772_v33 = vpop.f32.mrf.mxu0  ;;  %v784_v34 = vpop.f32.mrf.mxu1 }
 0x157   : > { %565 = vst.msk [vmem:[%s1016_s15 + $0x10] sm:$0xff] %vm562_vm0, %v494_v31  ;;  %573 = vst.msk [vmem:[%s1016_s15 + $0x50] sm:$0xff] %vm562_vm0, %v534_v32  ;;  %v509_v35 = vadd.f32 %v772_v33, %v365_v7  ;;  %v549_v36 = vadd.f32 %v784_v34, %v405_v25 }
 0x158   : > { %v503_v37 = vpop.f32.mrf.mxu0  ;;  %v543_v38 = vpop.f32.mrf.mxu1 }
 0x159   : > { %568 = vst.msk [vmem:[%s1016_s15 + $0x28] sm:$0xff] %vm562_vm0, %v509_v35  ;;  %576 = vst.msk [vmem:[%s1016_s15 + $0x68] sm:$0xff] %vm562_vm0, %v549_v36  ;;  %v504_v40 = vadd.f32 %v503_v37, %v360_v8  ;;  %v544_v41 = vadd.f32 %v543_v38, %v400_v30 }
 0x15a   : > { %v775_v42 = vpop.f32.mrf.mxu0  ;;  %v787_v43 = vpop.f32.mrf.mxu1 }
 0x15b   : > { %567 = vst.msk [vmem:[%s1016_s15 + $0x20] sm:$0xff] %vm562_vm0, %v504_v40  ;;  %575 = vst.msk [vmem:[%s1016_s15 + $0x60] sm:$0xff] %vm562_vm0, %v544_v41  ;;  %v519_v45 = vadd.f32 %v775_v42, %v375_v9  ;;  %v559_v46 = vadd.f32 %v787_v43, %v415_v39 }
 0x15c   : > { %v513_v47 = vpop.f32.mrf.mxu0  ;;  %v553_v48 = vpop.f32.mrf.mxu1 }
 0x15d   : > { %570 = vst.msk [vmem:[%s1016_s15 + $0x38] sm:$0xff] %vm562_vm0, %v519_v45  ;;  %578 = vst.msk [vmem:[%s1016_s15 + $0x78] sm:$0xff] %vm562_vm0, %v559_v46  ;;  %v514_v49 = vadd.f32 %v513_v47, %v370_v10  ;;  %v554_v50 = vadd.f32 %v553_v48, %v410_v44 }
 0x15f   : > { %569 = vst.msk [vmem:[%s1016_s15 + $0x30] sm:$0xff] %vm562_vm0, %v514_v49  ;;  %577 = vst.msk [vmem:[%s1016_s15 + $0x70] sm:$0xff] %vm562_vm0, %v554_v50 }
 0x160 PF: > { %s14_s17 = sadd.s32 1, %s869_s17   ;;  %s1064_s15 = smov %s865_s16 }
 0x161   : > { %p11_p5 = scmp.ge.s32.totalorder %s14_s17, 4   ;;  %s1065_s16 = smov %s1067_s18 }
 0x163   :  { %13 = sbr.rel (!%p11_p5) target bundleno = 2 (0x2), region = 72 }

</bundles_post_ra>
